<compile_context>
chip_gen: v5e
topology: v5e:2x2
jax: 0.10.0
libtpu: 0.0.40
codegen_flags: <defaults>
</compile_context>

<pallas_src>
import functools
import math

import jax
import jax.numpy as jnp
from jax.experimental import pallas as pl
from jax.experimental.pallas import tpu as pltpu

_LANE = 128
_TARGET_ELEMS = 1 << 20  # ~1M elements per tile (~16 MiB double-buffered i32+f32)


def _mask_kernel(x_ref, o_ref, *, pad):
    # Pure VPU elementwise compare + cast on one VMEM tile.
    o_ref[...] = (x_ref[...] != pad).astype(o_ref.dtype)


def _mask_2d(x2d, pad, out_dtype):
    """Run the mask kernel on a 2-D, lane-dense (C % 128 == 0) array."""
    R, C = x2d.shape
    in_item = x2d.dtype.itemsize
    out_item = jnp.dtype(out_dtype).itemsize

    # ---- lane (last) block dim: prefer full rows (one contiguous DMA / block);
    # only split the lane axis when even 8 full rows exceed the tile budget.
    if 8 * C <= _TARGET_ELEMS:
        bn = C
    else:
        bn = max(_LANE, min(C, ((_TARGET_ELEMS // 8) // _LANE) * _LANE))

    # ---- sublane block dim: multiple of 8 (or full R), sized to the budget.
    if R <= 8:
        bm = R
    else:
        rows_for_target = max(8, ((_TARGET_ELEMS // bn) // 8) * 8)
        bm = min((R // 8) * 8, rows_for_target)

    grid_r = pl.cdiv(R, bm)
    grid_c = pl.cdiv(C, bn)

    # ---- megacore: make sure there are >= 2 parallel steps for large arrays.
    if grid_r * grid_c == 1 and R * C >= (256 * 1024):
        if bm >= 16:
            bm = max(8, ((bm // 2) // 8) * 8)
            grid_r = pl.cdiv(R, bm)
        elif bn >= 2 * _LANE:
            bn = max(_LANE, ((bn // 2) // _LANE) * _LANE)
            grid_c = pl.cdiv(C, bn)

    # ---- VMEM budget: double-buffered input + output tiles, plus headroom.
    tile_bytes = bm * bn * (in_item + out_item)
    vmem_limit = int(min(max(2 * tile_bytes + (8 << 20), 16 << 20), 40 << 20))

    n_elems = R * C
    kernel = functools.partial(_mask_kernel, pad=pad)

    return pl.pallas_call(
        kernel,
        out_shape=jax.ShapeDtypeStruct((R, C), out_dtype),
        grid=(grid_r, grid_c),
        in_specs=[pl.BlockSpec((bm, bn), lambda i, j: (i, j))],
        out_specs=pl.BlockSpec((bm, bn), lambda i, j: (i, j)),
        compiler_params=pltpu.CompilerParams(
            dimension_semantics=("parallel", "parallel"),
            vmem_limit_bytes=vmem_limit,
        ),
        cost_estimate=pl.CostEstimate(
            flops=n_elems,
            transcendentals=0,
            bytes_accessed=n_elems * (in_item + out_item),
        ),
    )(x2d)


def mask(inputs, pad=0, *, out_dtype=jnp.float32):
    """Elementwise mask: 1 where inputs != pad, else 0 (float32 by default).

    Accepts any shape; purely elementwise, so the wrapper picks a lane-dense
    2-D working layout via free reshapes (plus padding for ragged sizes).
    """
    orig_shape = inputs.shape
    total = math.prod(orig_shape) if orig_shape else 1
    if total == 0:
        return jnp.zeros(orig_shape, out_dtype)

    if inputs.ndim >= 2 and orig_shape[-1] % _LANE == 0:
        # Natural layout already lane-dense; collapse leading dims (free).
        x2d = inputs.reshape(-1, orig_shape[-1])
        out2d = _mask_2d(x2d, pad, out_dtype)
        return out2d.reshape(orig_shape)

    if total % _LANE == 0:
        # Flatten to a lane-dense 2-D view with the widest dividing lane width.
        C = _LANE
        for cand in (4096, 2048, 1024, 512, 256):
            if total % cand == 0:
                C = cand
                break
        x2d = inputs.reshape(-1, C)
        out2d = _mask_2d(x2d, pad, out_dtype)
        return out2d.reshape(orig_shape)

    # Ragged total: pad the flat view to a multiple of 128 lanes, slice after.
    C = min(1024, pl.cdiv(total, _LANE) * _LANE)
    padded_total = pl.cdiv(total, C) * C
    flat = jnp.pad(inputs.reshape(-1), (0, padded_total - total))
    out2d = _mask_2d(flat.reshape(-1, C), pad, out_dtype)
    return out2d.reshape(-1)[:total].reshape(orig_shape)


if __name__ == "__main__":
    key = jax.random.PRNGKey(0)
    k1, k2 = jax.random.split(key)

    # Token-id style input, small shapes: batch=4, seq=16 (ragged -> padded path).
    x_small = jax.random.randint(k1, (4, 16), minval=0, maxval=3, dtype=jnp.int32)
    out_small = jax.block_until_ready(mask(x_small, pad=0))
    ref_small = (x_small != 0).astype(jnp.float32)
    assert out_small.shape == ref_small.shape and out_small.dtype == jnp.float32
    assert bool(jnp.all(out_small == ref_small))

    # Lane-dense path: batch=2, seq=128.
    x_dense = jax.random.randint(k2, (2, 128), minval=0, maxval=3, dtype=jnp.int32)
    out_dense = jax.block_until_ready(mask(x_dense, pad=0))
    ref_dense = (x_dense != 0).astype(jnp.float32)
    assert out_dense.shape == ref_dense.shape and out_dense.dtype == jnp.float32
    assert bool(jnp.all(out_dense == ref_dense))

    print("KERNEL_OK")
</pallas_src>

<mosaic_0001>
module attributes {stable_mosaic.version = 11 : i64} {
  func.func @_mask_kernel(%arg0: i32, %arg1: i32, %arg2: memref<1x128xi32, #tpu.memory_space<vmem>>, %arg3: memref<1x128xf32, #tpu.memory_space<vmem>>) attributes {dimension_semantics = [#tpu.dimension_semantics<parallel>, #tpu.dimension_semantics<parallel>], iteration_bounds = array<i64: 1, 1>, scalar_prefetch = 0 : i64, scratch_operands = 0 : i64, tpu.core_type = #tpu.core_type<tc>, window_params = [{transform_indices = @transform_0, window_bounds = array<i64: 1, 128>}, {transform_indices = @transform_1, window_bounds = array<i64: 1, 128>}]} {
    %c0 = arith.constant 0 : index
    %c0_0 = arith.constant 0 : index
    %0 = vector.load %arg2[%c0, %c0_0] : memref<1x128xi32, #tpu.memory_space<vmem>>, vector<1x128xi32>
    %c0_i32 = arith.constant 0 : i32
    %1 = vector.broadcast %c0_i32 : i32 to vector<1x128xi32>
    %2 = arith.cmpi ne, %0, %1 : vector<1x128xi32>
    %3 = arith.extui %2 : vector<1x128xi1> to vector<1x128xi32>
    %4 = arith.sitofp %3 : vector<1x128xi32> to vector<1x128xf32>
    %c0_1 = arith.constant 0 : index
    %c0_2 = arith.constant 0 : index
    %5 = vector.load %arg3[%c0_1, %c0_2] : memref<1x128xf32, #tpu.memory_space<vmem>>, vector<1x128xf32>
    tpu.vector_store %arg3[%c0_1, %c0_2], %4 {strides = array<i32>} : memref<1x128xf32, #tpu.memory_space<vmem>>, vector<1x128xf32>,
    return
  }
  func.func @transform_0(%arg0: i32, %arg1: i32) -> (i32, i32) {
    %c0_i32 = arith.constant 0 : i32
    return %arg0, %arg1 : i32, i32
  }
  func.func @transform_1(%arg0: i32, %arg1: i32) -> (i32, i32) {
    %c0_i32 = arith.constant 0 : i32
    return %arg0, %arg1 : i32, i32
  }
}

</mosaic_0001>

<bundles_post_ra>
// kernel: tpu_custom_call.1
= control target key start
LH: loop header
LB: loop body
LE: loop exit
PB: predicated region body
PF: predicated region fallthrough
CT: control target
= control target key end

     0   :  { %6 = vsyncpa [#allocation3], 0  ;;  %s120_s0 = inlined_call_operand.hbm [shape: s32[1,128], index: 0, kind: input, shape index: {}]   ;;  %s121_s1 = inlined_call_operand.hbm [shape: f32[1,128], index: 1, kind: output, shape index: {}]  }
   0x1   :  { %7 = vsyncpa [#allocation4], 0  ;;  %s13_s8 = sshll.u32 %s120_s0, 4  ;;  %s101_s9 = smov [#allocation2]   ;;  %s14_s8 = int_to_ptr.hbm [resolvable:$true] %s13_s8 }
   0x2   :  { %s15_s10 = sshll.u32 %s101_s9, 4  ;;  %s16_s10 = int_to_ptr.vmem [resolvable:$true] %s15_s10 }
   0x3   :  { %18 = dma.hbm_to_vmem [thread:$0]  %s14_s8, 16, %s16_s10, [#allocation3]  }
   0x4   :  { %97 = dma.done.wait [#allocation3], 16  }
   0x5   :  { %98 = vsyncadd [#allocation3], 4294967280  ;;  %s102_s11 = smov [#allocation5]   ;;  %s35_s15 = sshll.u32 %s121_s1, 4  ;;  %v23_v0 = vld [vmem:[#allocation2] sm:$0x1]  ;;  %s36_s15 = int_to_ptr.hbm [resolvable:$true] %s35_s15 }
   0x6   :  { %s33_s12 = sshll.u32 %s102_s11, 4  ;;  %vm24_vm0 = vcmp.ne.s32.totalorder %v23_v0, 0  ;;  %v103_v1 = vmov 0.0   ;;  %s34_s12 = int_to_ptr.vmem [resolvable:$true] %s33_s12 }
   0x7   :  { %v45_v2 = vsel %vm24_vm0, 1.0, %v103_v1 }
   0x8   :  { %27 = vst [vmem:[#allocation5] sm:$0x1] %v45_v2 }
   0x9   :  { %38 = dma.vmem_to_hbm [thread:$0]  %s34_s12, 16, %s36_s15, [#allocation4]  }
   0xa   :  { %99 = dma.done.wait [#allocation4], 16  }
   0xb   :  { %100 = vsyncadd [#allocation4], 4294967280 }
   0xc   :  { %43 = vsyncpa [#allocation3], 1 }
   0xd   :  { %44 = vsyncpa [#allocation4], 1 }

</bundles_post_ra>
